<compile_context>
chip_gen: v5e
topology: v5e:2x2
jax: 0.10.0
libtpu: 0.0.40
codegen_flags: <defaults>
</compile_context>

<pallas_src>
import functools

import jax
import jax.numpy as jnp
from jax.experimental import pallas as pl
from jax.experimental.pallas import tpu as pltpu


def _round_up(x, m):
    return ((x + m - 1) // m) * m


# ----------------------------------------------------------------------------
# Pallas kernel: one fused Aggregator('sum') pass over a row tile
# ----------------------------------------------------------------------------
def _aggregator_kernel(self_ref, nbr_ref, rel_ref, usr_ref,
                       s_ref, e_ref, g_ref, w_ref, b_ref, out_ref, *, act_name):
    """Row-tile aggregation.

    self_ref: [TM, D]      self vectors (f32)
    nbr_ref : [TM, N*D]    neighbor entity embeddings, lane-dense (bf16)
    rel_ref : [TM, N*D]    neighbor relation embeddings, lane-dense (bf16)
    usr_ref : [1,  N*D]    user embedding tiled across the N neighbor slots (f32)
    s_ref   : [N*D, N]     0/1 selector: sums each D-chunk  -> per-neighbor score
    e_ref   : [N,  N*D]    0/1 selector: expands p over each D-chunk
    g_ref   : [N*D, D]     0/1 selector: sums over neighbors -> [TM, D]
    w_ref   : [D, D]       Linear weight stored [in, out]  (y = x @ W + b)
    b_ref   : [1, D]       Linear bias
    out_ref : [TM, D]      act((self + mixed_neighbors) @ W + b)
    """
    nbr = nbr_ref[...].astype(jnp.float32)                  # [TM, N*D]
    rel = rel_ref[...].astype(jnp.float32)                  # [TM, N*D]
    usr = usr_ref[...]                                      # [1,  N*D]

    # user-relation attention scores (per-neighbor dot product via MXU selector)
    prod = rel * usr                                        # [TM, N*D]
    scores = jnp.dot(prod, s_ref[...],
                     preferred_element_type=jnp.float32)    # [TM, N]

    # softmax over the N neighbors (EUP reciprocal keeps the VALU slot free)
    m = jnp.max(scores, axis=-1, keepdims=True)
    e = jnp.exp(scores - m)
    denom = jnp.sum(e, axis=-1, keepdims=True)
    p = e * pl.reciprocal(denom, approx=True)               # [TM, N]

    # weighted neighbor aggregation: expand p to lane-dense, multiply, reduce
    p_exp = jnp.dot(p, e_ref[...],
                    preferred_element_type=jnp.float32)     # [TM, N*D]
    agg = jnp.dot(p_exp * nbr, g_ref[...],
                  preferred_element_type=jnp.float32)       # [TM, D]

    # 'sum' aggregator: (self + agg) @ W + b, then activation
    x = self_ref[...] + agg                                 # [TM, D]
    y = jnp.dot(x, w_ref[...],
                preferred_element_type=jnp.float32) + b_ref[...]

    if act_name == "tanh":
        out_ref[...] = jnp.tanh(y)
    else:
        out_ref[...] = jax.nn.sigmoid(y)


# ----------------------------------------------------------------------------
# Pallas wrapper: tiled / pipelined call over (batch, row-tile) grid
# ----------------------------------------------------------------------------
def aggregator_pallas(self_cat, nbr_cat, rel_cat, usr_tiled,
                      sel_s, sel_e, sel_g, w, b, act_name, *, tile_m):
    B, Mt, D = self_cat.shape
    ND = nbr_cat.shape[-1]
    N = sel_s.shape[-1]
    assert Mt % tile_m == 0
    grid = (B, Mt // tile_m)

    kernel = functools.partial(_aggregator_kernel, act_name=act_name)

    # Advisory cost estimate for the fused call.
    rows = B * Mt
    flops = int(rows * (ND + 2 * ND * N + 4 * N + 2 * N * ND
                        + ND + 2 * ND * D + 2 * D + 2 * D * D + D))
    transcend = int(rows * (N + 1 + D))
    bytes_acc = int(rows * D * 4              # self (f32)
                    + 2 * rows * ND * 2       # nbr + rel (bf16)
                    + B * ND * 4              # user (resident per batch row)
                    + rows * D * 4            # output (f32)
                    + (ND * N * 2 + ND * D + D * D + D) * 4)  # selectors + W + b

    return pl.pallas_call(
        kernel,
        out_shape=jax.ShapeDtypeStruct((B, Mt, D), jnp.float32),
        grid=grid,
        in_specs=[
            pl.BlockSpec((None, tile_m, D), lambda bi, mi: (bi, mi, 0)),   # self
            pl.BlockSpec((None, tile_m, ND), lambda bi, mi: (bi, mi, 0)),  # nbr (bf16)
            pl.BlockSpec((None, tile_m, ND), lambda bi, mi: (bi, mi, 0)),  # rel (bf16)
            pl.BlockSpec((None, 1, ND), lambda bi, mi: (bi, 0, 0)),        # user (per-batch, resident)
            pl.BlockSpec((ND, N), lambda bi, mi: (0, 0)),                  # selector S (resident)
            pl.BlockSpec((N, ND), lambda bi, mi: (0, 0)),                  # selector E (resident)
            pl.BlockSpec((ND, D), lambda bi, mi: (0, 0)),                  # selector G (resident)
            pl.BlockSpec((D, D), lambda bi, mi: (0, 0)),                   # W (resident)
            pl.BlockSpec((1, D), lambda bi, mi: (0, 0)),                   # b (resident)
        ],
        out_specs=pl.BlockSpec((None, tile_m, D), lambda bi, mi: (bi, mi, 0)),
        compiler_params=pltpu.CompilerParams(
            dimension_semantics=("parallel", "parallel"),
            vmem_limit_bytes=32 * 1024 * 1024,
        ),
        cost_estimate=pl.CostEstimate(
            flops=flops, transcendentals=transcend, bytes_accessed=bytes_acc),
    )(self_cat, nbr_cat, rel_cat, usr_tiled, sel_s, sel_e, sel_g, w, b)


def _make_selectors(n_neighbor, dim, dtype=jnp.float32):
    k = jnp.arange(n_neighbor * dim)
    sel_s = (k[:, None] // dim == jnp.arange(n_neighbor)[None, :]).astype(dtype)  # [N*D, N]
    sel_e = sel_s.T                                                               # [N, N*D]
    sel_g = (k[:, None] % dim == jnp.arange(dim)[None, :]).astype(dtype)          # [N*D, D]
    return sel_s, sel_e, sel_g


# ----------------------------------------------------------------------------
# KGCN forward (glue: gathers / reshapes in plain JAX; math in Pallas)
# ----------------------------------------------------------------------------
def kgcn_forward(u, v, params, adj_ent, adj_rel, *,
                 n_iter, n_neighbor, dim, tile_m_target=512):
    B = u.shape[0]
    N = n_neighbor
    ND = N * dim

    usr_tab = params["usr"]          # [num_user, D]
    ent_tab = params["ent"]          # [num_ent,  D]
    rel_tab = params["rel"]          # [num_rel,  D]
    W = params["agg_w"]              # [D, D]  (stored [in, out])
    b = params["agg_b"].reshape(1, dim)

    user_embeddings = usr_tab[u]                         # [B, D] f32

    # _get_neighbors: fixed-fanout adjacency walk (index glue, plain JAX)
    entities = [v.reshape(B, 1)]
    relations = []
    for h in range(n_iter):
        entities.append(adj_ent[entities[h]].reshape(B, -1))
        relations.append(adj_rel[entities[h]].reshape(B, -1))

    # embedding lookups (gather glue); relations pre-flattened lane-dense bf16
    entity_vectors = [ent_tab[e] for e in entities]                        # f32 [B, n^h, D]
    relation_flat = [rel_tab[r].reshape(B, -1, ND).astype(jnp.bfloat16)
                     for r in relations]                                   # bf16 [B, n^h, N*D]

    # user embedding tiled once over the N neighbor slots: [B, 1, N*D]
    usr_tiled = jnp.tile(user_embeddings[:, None, :], (1, 1, N))

    sel_s, sel_e, sel_g = _make_selectors(N, dim)

    # _aggregate: one fused Pallas launch per iteration (hops concatenated on M)
    for i in range(n_iter):
        act_name = "tanh" if i == n_iter - 1 else "sigmoid"
        hops = n_iter - i
        m_sizes = [n_neighbor ** h for h in range(hops)]
        m_tot = sum(m_sizes)

        self_cat = jnp.concatenate([entity_vectors[h] for h in range(hops)], axis=1)
        nbr_cat = jnp.concatenate(
            [entity_vectors[h + 1].reshape(B, m_sizes[h], ND) for h in range(hops)],
            axis=1).astype(jnp.bfloat16)
        rel_cat = jnp.concatenate([relation_flat[h] for h in range(hops)], axis=1)

        # row tile: 512 rows at production sizes, padded multiple of 16 otherwise
        tile_m = tile_m_target if m_tot >= tile_m_target else _round_up(m_tot, 16)
        m_pad = _round_up(m_tot, tile_m)
        if m_pad != m_tot:
            pads = ((0, 0), (0, m_pad - m_tot), (0, 0))
            self_cat = jnp.pad(self_cat, pads)
            nbr_cat = jnp.pad(nbr_cat, pads)
            rel_cat = jnp.pad(rel_cat, pads)

        out = aggregator_pallas(self_cat, nbr_cat, rel_cat, usr_tiled,
                                sel_s, sel_e, sel_g, W, b, act_name,
                                tile_m=tile_m)

        # split the fused output back into per-hop vectors for the next iteration
        next_vectors = []
        off = 0
        for h in range(hops):
            next_vectors.append(out[:, off:off + m_sizes[h], :])
            off += m_sizes[h]
        entity_vectors = next_vectors

    item_embeddings = entity_vectors[0].reshape(B, dim)

    # final score: one scalar per row -> plain JAX (avoids a masked [B,1] store)
    return jax.nn.sigmoid(jnp.sum(user_embeddings * item_embeddings, axis=-1))


# ----------------------------------------------------------------------------
# Pure-JAX reference (mirrors the bf16 streaming casts) for a sanity check
# ----------------------------------------------------------------------------
def kgcn_reference(u, v, params, adj_ent, adj_rel, *, n_iter, n_neighbor, dim):
    B = u.shape[0]
    usr_tab, ent_tab, rel_tab = params["usr"], params["ent"], params["rel"]
    W, bb = params["agg_w"], params["agg_b"]
    user = usr_tab[u]
    entities = [v.reshape(B, 1)]
    relations = []
    for h in range(n_iter):
        entities.append(adj_ent[entities[h]].reshape(B, -1))
        relations.append(adj_rel[entities[h]].reshape(B, -1))
    ev = [ent_tab[e] for e in entities]
    rv = [rel_tab[r] for r in relations]
    for i in range(n_iter):
        act = jnp.tanh if i == n_iter - 1 else jax.nn.sigmoid
        nxt = []
        for hop in range(n_iter - i):
            self_v = ev[hop]
            nbr = ev[hop + 1].reshape(B, -1, n_neighbor, dim)
            nbr = nbr.astype(jnp.bfloat16).astype(jnp.float32)
            rel = rv[hop].reshape(B, -1, n_neighbor, dim)
            rel = rel.astype(jnp.bfloat16).astype(jnp.float32)
            sc = jnp.sum(user[:, None, None, :] * rel, axis=-1)
            p = jax.nn.softmax(sc, axis=-1)
            agg = jnp.sum(p[..., None] * nbr, axis=2)
            y = (self_v + agg) @ W + bb
            nxt.append(act(y))
        ev = nxt
    item = ev[0].reshape(B, dim)
    return jax.nn.sigmoid(jnp.sum(user * item, axis=-1))


# ----------------------------------------------------------------------------
# Main
# ----------------------------------------------------------------------------
if __name__ == "__main__":
    # Small, KGCN-consistent sizes
    num_user, num_ent, num_rel = 10, 20, 5
    dim = 32
    n_neighbor = 4          # args.neighbor_sample_size
    n_iter = 2              # args.n_iter
    batch = 2
    # aggregator = 'sum'   (default in the reference repo)

    key = jax.random.PRNGKey(0)
    k_usr, k_ent, k_rel, k_w, k_b, k_ae, k_ar, k_u, k_v = jax.random.split(key, 9)

    params = {
        "usr": jax.random.normal(k_usr, (num_user, dim), jnp.float32),
        "ent": jax.random.normal(k_ent, (num_ent, dim), jnp.float32),
        "rel": jax.random.normal(k_rel, (num_rel, dim), jnp.float32),
        # torch.nn.Linear(dim, dim): weight [out,in]; stored here as [in,out]
        "agg_w": jax.random.normal(k_w, (dim, dim), jnp.float32) * 0.1,
        "agg_b": jax.random.normal(k_b, (dim,), jnp.float32) * 0.1,
    }

    # _gen_adj: fixed-size sampled adjacency (synthetic, deterministic)
    # TODO(synk): KG dict sampling happens on host in the reference; represented
    # here directly by the sampled adjacency tables.
    adj_ent = jax.random.randint(k_ae, (num_ent, n_neighbor), 0, num_ent, jnp.int32)
    adj_rel = jax.random.randint(k_ar, (num_ent, n_neighbor), 0, num_rel, jnp.int32)

    u = jax.random.randint(k_u, (batch,), 0, num_user, jnp.int32)
    v = jax.random.randint(k_v, (batch,), 0, num_ent, jnp.int32)

    scores = kgcn_forward(u, v, params, adj_ent, adj_rel,
                          n_iter=n_iter, n_neighbor=n_neighbor, dim=dim)
    scores = jax.block_until_ready(scores)

    ref = kgcn_reference(u, v, params, adj_ent, adj_rel,
                         n_iter=n_iter, n_neighbor=n_neighbor, dim=dim)
    ref = jax.block_until_ready(ref)

    assert scores.shape == (batch,)
    assert bool(jnp.all((scores >= 0.0) & (scores <= 1.0)))
    assert bool(jnp.max(jnp.abs(scores - ref)) < 5e-2), (scores, ref)
    print("KERNEL_OK")
</pallas_src>

<mosaic_0001>
module attributes {stable_mosaic.version = 11 : i64} {
  func.func @_aggregator_kernel(%arg0: i32, %arg1: i32, %arg2: memref<1x16x32xf32, #tpu.memory_space<vmem>>, %arg3: memref<1x16x128xbf16, #tpu.memory_space<vmem>>, %arg4: memref<1x16x128xbf16, #tpu.memory_space<vmem>>, %arg5: memref<1x1x128xf32, #tpu.memory_space<vmem>>, %arg6: memref<128x4xf32, #tpu.memory_space<vmem>>, %arg7: memref<4x128xf32, #tpu.memory_space<vmem>>, %arg8: memref<128x32xf32, #tpu.memory_space<vmem>>, %arg9: memref<32x32xf32, #tpu.memory_space<vmem>>, %arg10: memref<1x32xf32, #tpu.memory_space<vmem>>, %arg11: memref<1x16x32xf32, #tpu.memory_space<vmem>>) attributes {dimension_semantics = [#tpu.dimension_semantics<parallel>, #tpu.dimension_semantics<parallel>], iteration_bounds = array<i64: 2, 1>, scalar_prefetch = 0 : i64, scratch_operands = 0 : i64, tpu.core_type = #tpu.core_type<tc>, window_params = [{transform_indices = @transform_0, window_bounds = array<i64: 1, 16, 32>}, {transform_indices = @transform_1, window_bounds = array<i64: 1, 16, 128>}, {transform_indices = @transform_2, window_bounds = array<i64: 1, 16, 128>}, {transform_indices = @transform_3, window_bounds = array<i64: 1, 1, 128>}, {pipeline_mode = #tpu.pipeline_mode<synchronous>, transform_indices = @transform_4, window_bounds = array<i64: 128, 4>}, {pipeline_mode = #tpu.pipeline_mode<synchronous>, transform_indices = @transform_5, window_bounds = array<i64: 4, 128>}, {pipeline_mode = #tpu.pipeline_mode<synchronous>, transform_indices = @transform_6, window_bounds = array<i64: 128, 32>}, {pipeline_mode = #tpu.pipeline_mode<synchronous>, transform_indices = @transform_7, window_bounds = array<i64: 32, 32>}, {pipeline_mode = #tpu.pipeline_mode<synchronous>, transform_indices = @transform_8, window_bounds = array<i64: 1, 32>}, {transform_indices = @transform_9, window_bounds = array<i64: 1, 16, 32>}]} {
    %c0 = arith.constant 0 : index
    %c0_0 = arith.constant 0 : index
    %c0_1 = arith.constant 0 : index
    %0 = vector.load %arg3[%c0, %c0_0, %c0_1] : memref<1x16x128xbf16, #tpu.memory_space<vmem>>, vector<1x16x128xbf16>
    %1 = vector.shape_cast %0 : vector<1x16x128xbf16> to vector<16x128xbf16>
    %2 = arith.extf %1 : vector<16x128xbf16> to vector<16x128xf32>
    %c0_2 = arith.constant 0 : index
    %c0_3 = arith.constant 0 : index
    %c0_4 = arith.constant 0 : index
    %3 = vector.load %arg4[%c0_2, %c0_3, %c0_4] : memref<1x16x128xbf16, #tpu.memory_space<vmem>>, vector<1x16x128xbf16>
    %4 = vector.shape_cast %3 : vector<1x16x128xbf16> to vector<16x128xbf16>
    %5 = arith.extf %4 : vector<16x128xbf16> to vector<16x128xf32>
    %c0_5 = arith.constant 0 : index
    %c0_6 = arith.constant 0 : index
    %c0_7 = arith.constant 0 : index
    %6 = vector.load %arg5[%c0_5, %c0_6, %c0_7] : memref<1x1x128xf32, #tpu.memory_space<vmem>>, vector<1x1x128xf32>
    %7 = vector.shape_cast %6 : vector<1x1x128xf32> to vector<1x128xf32>
    %8 = vector.broadcast %7 : vector<1x128xf32> to vector<16x128xf32>
    %9 = arith.mulf %5, %8 : vector<16x128xf32>
    %c0_8 = arith.constant 0 : index
    %c0_9 = arith.constant 0 : index
    %10 = vector.load %arg6[%c0_8, %c0_9] : memref<128x4xf32, #tpu.memory_space<vmem>>, vector<128x4xf32>
    %cst = arith.constant dense<0.000000e+00> : vector<16x4xf32>
    %11 = tpu.matmul %9, %10, %cst {dimension_numbers = #tpu.dot_dimension_numbers<[1], [0], [0], [1], [0, 0, 1, 1], [], []>} : vector<16x128xf32>, vector<128x4xf32>, vector<16x4xf32> -> vector<16x4xf32>
    %cst_10 = arith.constant dense<0xFF800000> : vector<16xf32>
    %12 = vector.multi_reduction <maximumf>, %11, %cst_10 [1] : vector<16x4xf32> to vector<16xf32>
    %13 = vector.shape_cast %12 : vector<16xf32> to vector<16x1xf32>
    %14 = vector.broadcast %13 : vector<16x1xf32> to vector<16x4xf32>
    %15 = arith.subf %11, %14 : vector<16x4xf32>
    %16 = math.exp %15 : vector<16x4xf32>
    %cst_11 = arith.constant dense<0.000000e+00> : vector<16xf32>
    %17 = vector.multi_reduction <add>, %16, %cst_11 [1] : vector<16x4xf32> to vector<16xf32>
    %18 = vector.shape_cast %17 : vector<16xf32> to vector<16x1xf32>
    %19 = tpu.reciprocal %18 {approx = true} : vector<16x1xf32> -> vector<16x1xf32>
    %20 = vector.broadcast %19 : vector<16x1xf32> to vector<16x4xf32>
    %21 = arith.mulf %16, %20 : vector<16x4xf32>
    %c0_12 = arith.constant 0 : index
    %c0_13 = arith.constant 0 : index
    %22 = vector.load %arg7[%c0_12, %c0_13] : memref<4x128xf32, #tpu.memory_space<vmem>>, vector<4x128xf32>
    %cst_14 = arith.constant dense<0.000000e+00> : vector<16x128xf32>
    %23 = tpu.matmul %21, %22, %cst_14 {dimension_numbers = #tpu.dot_dimension_numbers<[1], [0], [0], [1], [0, 0, 1, 1], [], []>} : vector<16x4xf32>, vector<4x128xf32>, vector<16x128xf32> -> vector<16x128xf32>
    %24 = arith.mulf %23, %2 : vector<16x128xf32>
    %c0_15 = arith.constant 0 : index
    %c0_16 = arith.constant 0 : index
    %25 = vector.load %arg8[%c0_15, %c0_16] : memref<128x32xf32, #tpu.memory_space<vmem>>, vector<128x32xf32>
    %cst_17 = arith.constant dense<0.000000e+00> : vector<16x32xf32>
    %26 = tpu.matmul %24, %25, %cst_17 {dimension_numbers = #tpu.dot_dimension_numbers<[1], [0], [0], [1], [0, 0, 1, 1], [], []>} : vector<16x128xf32>, vector<128x32xf32>, vector<16x32xf32> -> vector<16x32xf32>
    %c0_18 = arith.constant 0 : index
    %c0_19 = arith.constant 0 : index
    %c0_20 = arith.constant 0 : index
    %27 = vector.load %arg2[%c0_18, %c0_19, %c0_20] : memref<1x16x32xf32, #tpu.memory_space<vmem>>, vector<1x16x32xf32>
    %28 = vector.shape_cast %27 : vector<1x16x32xf32> to vector<16x32xf32>
    %29 = arith.addf %28, %26 : vector<16x32xf32>
    %c0_21 = arith.constant 0 : index
    %c0_22 = arith.constant 0 : index
    %30 = vector.load %arg9[%c0_21, %c0_22] : memref<32x32xf32, #tpu.memory_space<vmem>>, vector<32x32xf32>
    %cst_23 = arith.constant dense<0.000000e+00> : vector<16x32xf32>
    %31 = tpu.matmul %29, %30, %cst_23 {dimension_numbers = #tpu.dot_dimension_numbers<[1], [0], [0], [1], [0, 0, 1, 1], [], []>} : vector<16x32xf32>, vector<32x32xf32>, vector<16x32xf32> -> vector<16x32xf32>
    %c0_24 = arith.constant 0 : index
    %c0_25 = arith.constant 0 : index
    %32 = vector.load %arg10[%c0_24, %c0_25] : memref<1x32xf32, #tpu.memory_space<vmem>>, vector<1x32xf32>
    %33 = vector.broadcast %32 : vector<1x32xf32> to vector<16x32xf32>
    %34 = arith.addf %31, %33 : vector<16x32xf32>
    %35 = arith.negf %34 : vector<16x32xf32>
    %36 = math.exp %35 : vector<16x32xf32>
    %cst_26 = arith.constant 1.000000e+00 : f32
    %37 = vector.broadcast %cst_26 : f32 to vector<16x32xf32>
    %38 = arith.addf %37, %36 : vector<16x32xf32>
    %39 = arith.divf %37, %38 : vector<16x32xf32>
    %c0_27 = arith.constant 0 : index
    %c0_28 = arith.constant 0 : index
    %c0_29 = arith.constant 0 : index
    %40 = vector.load %arg11[%c0_27, %c0_28, %c0_29] : memref<1x16x32xf32, #tpu.memory_space<vmem>>, vector<1x16x32xf32>
    %41 = vector.shape_cast %40 : vector<1x16x32xf32> to vector<16x32xf32>
    %42 = vector.shape_cast %39 : vector<16x32xf32> to vector<1x16x32xf32>
    tpu.vector_store %arg11[%c0_27, %c0_28, %c0_29], %42 {strides = array<i32>} : memref<1x16x32xf32, #tpu.memory_space<vmem>>, vector<1x16x32xf32>,
    return
  }
  func.func @transform_0(%arg0: i32, %arg1: i32) -> (i32, i32, i32) {
    %c0_i32 = arith.constant 0 : i32
    %c0_i32_0 = arith.constant 0 : i32
    return %arg0, %arg1, %c0_i32 : i32, i32, i32
  }
  func.func @transform_1(%arg0: i32, %arg1: i32) -> (i32, i32, i32) {
    %c0_i32 = arith.constant 0 : i32
    %c0_i32_0 = arith.constant 0 : i32
    return %arg0, %arg1, %c0_i32 : i32, i32, i32
  }
  func.func @transform_2(%arg0: i32, %arg1: i32) -> (i32, i32, i32) {
    %c0_i32 = arith.constant 0 : i32
    %c0_i32_0 = arith.constant 0 : i32
    return %arg0, %arg1, %c0_i32 : i32, i32, i32
  }
  func.func @transform_3(%arg0: i32, %arg1: i32) -> (i32, i32, i32) {
    %c0_i32 = arith.constant 0 : i32
    %c0_i32_0 = arith.constant 0 : i32
    %c0_i32_1 = arith.constant 0 : i32
    return %arg0, %c0_i32, %c0_i32_0 : i32, i32, i32
  }
  func.func @transform_4(%arg0: i32, %arg1: i32) -> (i32, i32) {
    %c0_i32 = arith.constant 0 : i32
    %c0_i32_0 = arith.constant 0 : i32
    %c0_i32_1 = arith.constant 0 : i32
    return %c0_i32, %c0_i32_0 : i32, i32
  }
  func.func @transform_5(%arg0: i32, %arg1: i32) -> (i32, i32) {
    %c0_i32 = arith.constant 0 : i32
    %c0_i32_0 = arith.constant 0 : i32
    %c0_i32_1 = arith.constant 0 : i32
    return %c0_i32, %c0_i32_0 : i32, i32
  }
  func.func @transform_6(%arg0: i32, %arg1: i32) -> (i32, i32) {
    %c0_i32 = arith.constant 0 : i32
    %c0_i32_0 = arith.constant 0 : i32
    %c0_i32_1 = arith.constant 0 : i32
    return %c0_i32, %c0_i32_0 : i32, i32
  }
  func.func @transform_7(%arg0: i32, %arg1: i32) -> (i32, i32) {
    %c0_i32 = arith.constant 0 : i32
    %c0_i32_0 = arith.constant 0 : i32
    %c0_i32_1 = arith.constant 0 : i32
    return %c0_i32, %c0_i32_0 : i32, i32
  }
  func.func @transform_8(%arg0: i32, %arg1: i32) -> (i32, i32) {
    %c0_i32 = arith.constant 0 : i32
    %c0_i32_0 = arith.constant 0 : i32
    %c0_i32_1 = arith.constant 0 : i32
    return %c0_i32, %c0_i32_0 : i32, i32
  }
  func.func @transform_9(%arg0: i32, %arg1: i32) -> (i32, i32, i32) {
    %c0_i32 = arith.constant 0 : i32
    %c0_i32_0 = arith.constant 0 : i32
    return %arg0, %arg1, %c0_i32 : i32, i32, i32
  }
}

</mosaic_0001>

<bundles_post_ra>
// kernel: tpu_custom_call.1
= control target key start
LH: loop header
LB: loop body
LE: loop exit
PB: predicated region body
PF: predicated region fallthrough
CT: control target
= control target key end

     0   :  { %s1309_s0 = inlined_call_operand.vmem [shape: f32[2,16,32], index: 0, kind: input, shape index: {}]   ;;  %s1310_s1 = inlined_call_operand.vmem [shape: bf16[2,16,128], index: 1, kind: input, shape index: {}]   ;;  %s1311_s2 = inlined_call_operand.vmem [shape: bf16[2,16,128], index: 2, kind: input, shape index: {}]   ;;  %s1312_s3 = inlined_call_operand.vmem [shape: f32[2,1,128], index: 3, kind: input, shape index: {}]   ;;  %s1313_s4 = inlined_call_operand.vmem [shape: f32[128,4], index: 4, kind: input, shape index: {}]   ;;  %s1314_s5 = inlined_call_operand.vmem [shape: f32[4,128], index: 5, kind: input, shape index: {}]   ;;  %s1315_s6 = inlined_call_operand.vmem [shape: f32[128,32], index: 6, kind: input, shape index: {}]   ;;  %s1316_s7 = inlined_call_operand.vmem [shape: f32[32,32], index: 7, kind: input, shape index: {}]   ;;  %s1317_s8 = inlined_call_operand.vmem [shape: f32[1,32], index: 8, kind: input, shape index: {}]   ;;  %s1318_s9 = inlined_call_operand.hbm [shape: f32[2,16,32], index: 9, kind: output, shape index: {}]  }
   0x1   :  { %1320 = sst [smem:[#allocation6_spill]] %s1312_s3 }
   0x2   :  { %14 = vsyncpa [#allocation3], 0 }
   0x3   :  { %16 = vsyncpa [#allocation3 + $0x1], 0  ;;  %s1066_s30 = smov 0   ;;  %s1068_s10 = smov 0  }
   0x4   :  { %s1070_s11 = smov 0   ;;  %s1072_s12 = smov 0  }
   0x5   :  { %s1074_s13 = smov 0   ;;  %s1076_s14 = smov 0  }
   0x6 LB: > { %s823_s15 = sadd.s32 4294967295, %s1012_s14   ;;  %s824_s16 = sadd.s32 4294967294, %s1012_s14   ;;  %s1012_s14 = sphi %s1076_s14, %s22_s14   ;;  %s1008_s13 = sphi %s1074_s13, %s1330_s13   ;;  %s1004_s12 = sphi %s1072_s12, %s1329_s12   ;;  %s1000_s11 = sphi %s1070_s11, %s1328_s11   ;;  %s996_s10 = sphi %s1068_s10, %s1327_s10   ;;  %s992_s30 = sphi %s1066_s30, %s1326_s30  }
   0x7   : > { %s34_s17 = sadd.s32 1, %s1008_s13  ;;  %s258_s18 = sadd.s32 1, %s1000_s11 }
   0x8   : > { %p36_p0 = scmp.ge.s32.totalorder %s34_s17, 2  ;;  %p268_p1 = scmp.ne.s32.totalorder %s1000_s11, %s996_s10 }
   0x9   : > { %p269_p2 = scmp.eq.s32.totalorder %s823_s15, 1  ;;  %p274_p3 = scmp.ne.s32.totalorder %s996_s10, %s992_s30 }
   0xa   : > { %s1332_s17 = smov (%p36_p0, %s34_s17), 0  ;;  %p275_p5 = scmp.eq.s32.totalorder %s824_s16, 1 }
   0xb   : > { %1321 = sst [smem:[#allocation5_spill]] %s1332_s17  ;;  %p1106_p4 = por %p269_p2, %p268_p1 }
   0xc   : > { %s253_s20 = ssub.s32 %s1008_s13, %s1332_s17  ;;  %p827_p6 = scmp.ge.s32.totalorder %s1012_s14, 1 }
   0xd   : > { %p256_p7 = scmp.eq.s32.totalorder %s253_s20, 0  ;;  %p1113_p8 = por %p275_p5, %p274_p3 }
   0xe   : > { %p353_p9 = scmp.lt.s32.totalorder %s1012_s14, 3 }
   0xf   : > { %s1119_s22 = scalar_select %p256_p7, %s1000_s11, %s258_s18  }
  0x10   : > { %p354_p10 = pnand %p827_p6, %p353_p9 }
  0x11   : > { %p415_p11 = scmp.lt.s32.totalorder (!%p354_p10), %s1004_s12, 1  ;;  %s1324_s3 = sld [smem:[#allocation6_spill]] (!%p354_p10) }
  0x12   : > { %357 = sbr.rel (%p354_p10) target bundleno = 871 (0x367), region = 56 }
  0x17   : > { %v477_v0 = vld [vmem:[%s1313_s4 + $0x78] sm:$0xff]  ;;  %v476_v1 = vld [vmem:[%s1313_s4 + $0x70] sm:$0xff]  ;;  %v475_v2 = vld [vmem:[%s1313_s4 + $0x68] sm:$0xff]  ;;  %s1132_s29 = scalar_select %p415_p11, %s1004_s12, 1  ;;  %vm501_vm0 = vcmask 31744   ;;  %vm531_vm1 = vcmask 1043456  }
  0x18   : > { %478 = vmatpush.msra.mxu0 %v477_v0  ;;  %v474_v3 = vld [vmem:[%s1313_s4 + $0x60] sm:$0xff]  ;;  %v473_v4 = vld [vmem:[%s1313_s4 + $0x58] sm:$0xff]  ;;  %v472_v5 = vld [vmem:[%s1313_s4 + $0x50] sm:$0xff]  ;;  %vm611_vm2 = vcmask 261120  }
  0x19   : > { %s446_s23 = scalar_lea.vmem %s1324_s3, %s1132_s29  ;;  %v471_v6 = vld [vmem:[%s1313_s4 + $0x48] sm:$0xff]  ;;  %v470_v7 = vld [vmem:[%s1313_s4 + $0x40] sm:$0xff]  ;;  %v469_v8 = vld [vmem:[%s1313_s4 + $0x38] sm:$0xff]  ;;  %s848_s24 = sshll.u32 %s1132_s29, 3 }
  0x1a   : > { %479 = vmatpush.msra.mxu0 %v476_v1  ;;  %v468_v9 = vld [vmem:[%s1313_s4 + $0x30] sm:$0xff]  ;;  %v467_v10 = vld [vmem:[%s1313_s4 + $0x28] sm:$0xff]  ;;  %s442_s16 = scalar_lea.vmem %s1311_s2, %s848_s24  ;;  %v466_v11 = vld [vmem:[%s1313_s4 + $0x20] sm:$0xff]  ;;  %s432_s17 = scalar_lea.vmem %s1310_s1, %s848_s24 }
  0x1b   : > { %v856_v12 = vld [vmem:[%s442_s16] sm:$0xff]   ;;  %v465_v13 = vld [vmem:[%s1313_s4 + $0x18] sm:$0xff]  ;;  %v464_v14 = vld [vmem:[%s1313_s4 + $0x10] sm:$0xff]  ;;  %s847_s24 = sshll.u32 %s1132_s29, 4  ;;  %s411_s29 = sand.u32 1, %s996_s10  }
  0x1c   : > { %480 = vmatpush.msra.mxu0 %v475_v2  ;;  %v857_v15 = vunpack.c.l.bf16 %v856_v12  ;;  %v916_v16 = vld [vmem:[%s446_s23] ss:$0 sm:$0xff]  ;;  %v463_v17 = vld [vmem:[%s1313_s4 + $0x8] sm:$0xff]  ;;  %v858_v20 = vunpack.c.h.bf16 %v856_v12  ;;  %v575_v37 = vld [vmem:[%s1315_s6 + $0x78] sm:$0xff]  ;;  %s422_s20 = scalar_lea.vmem %s1309_s0, %s847_s24  ;;  %s828_s27 = sshll.u32 %s411_s29, 4 }
  0x1d   : > { %v462_v18 = vld [vmem:[%s1313_s4] sm:$0xff]  ;;  %v574_v38 = vld [vmem:[%s1315_s6 + $0x70] sm:$0xff]  ;;  %576 = vmatpush.msra.mxu2 %v575_v37  ;;  %v573_v39 = vld [vmem:[%s1315_s6 + $0x68] sm:$0xff]  ;;  %s413_s23 = scalar_lea.vmem [#allocation2], %s828_s27  ;;  %s682_s16 = scalar_lea.sflag [#allocation3], %s411_s29 }
  0x1e   : > { %481 = vmatpush.msra.mxu0 %v474_v3  ;;  %v460_v19 = vmul.f32 %v916_v16, %v857_v15  ;;  %v461_v21 = vmul.f32 %v916_v16, %v858_v20  ;;  %v524_v36 = vld [vmem:[%s1314_s5] sm:$0xf]  ;;  %v571_v41 = vld [vmem:[%s1315_s6 + $0x58] sm:$0xff]  ;;  %v570_v42 = vld [vmem:[%s1315_s6 + $0x50] sm:$0xff]  ;;  %s954_s27 = scalar_lea.hbm %s1318_s9, 32 }
  0x1f   : > { %835 = vmatpush.msk.msra.mxu1 %vm531_vm1, %v524_v36  ;;  %577 = vmatpush.msra.mxu2 %v574_v38  ;;  %v572_v40 = vld [vmem:[%s1315_s6 + $0x60] sm:$0xff]  ;;  %v569_v43 = vld [vmem:[%s1315_s6 + $0x48] sm:$0xff]  ;;  %v567_v46 = vld [vmem:[%s1315_s6 + $0x38] sm:$0xff] }
  0x20   : > { %482 = vmatpush.msra.mxu0 %v473_v4  ;;  %v568_v44 = vld [vmem:[%s1315_s6 + $0x40] sm:$0xff]  ;;  %v566_v47 = vld [vmem:[%s1315_s6 + $0x30] sm:$0xff]  ;;  %v565_v48 = vld [vmem:[%s1315_s6 + $0x28] sm:$0xff] }
  0x21   : > { %578 = vmatpush.msra.mxu2 %v573_v39  ;;  %v564_v49 = vld [vmem:[%s1315_s6 + $0x20] sm:$0xff]  ;;  %v563_v53 = vld [vmem:[%s1315_s6 + $0x18] sm:$0xff]  ;;  %v562_v54 = vld [vmem:[%s1315_s6 + $0x10] sm:$0xff] }
  0x22   : > { %483 = vmatpush.msra.mxu0 %v472_v5  ;;  %v561_v57 = vld [vmem:[%s1315_s6 + $0x8] sm:$0xff]  ;;  %v560_v58 = vld [vmem:[%s1315_s6] sm:$0xff]  ;;  %v606_v59 = vld [vmem:[%s1316_s7 + $0x18] sm:$0xff] }
  0x23   : > { %579 = vmatpush.msra.mxu2 %v572_v40  ;;  %v605_v60 = vld [vmem:[%s1316_s7 + $0x10] sm:$0xff]  ;;  %630 = vmatpush.msra.mxu3 %v606_v59  ;;  %v852_v61 = vld [vmem:[%s432_s17] sm:$0xff]   ;;  %v604_v4 = vld [vmem:[%s1316_s7 + $0x8] sm:$0xff]  ;;  %s850_s17 = sshll.u32 %s1004_s12, 4  ;;  %s696_s12 = sshll.u32 %s413_s23, 4  ;;  %s697_s12 = int_to_ptr.vmem [resolvable:$true] %s696_s12 }
  0x24   : > { %484 = vmatpush.msra.mxu0 %v471_v6  ;;  %v853_v62 = vunpack.c.l.bf16 %v852_v61  ;;  %v854_v1 = vunpack.c.h.bf16 %v852_v61  ;;  %v603_v5 = vld [vmem:[%s1316_s7] sm:$0xff]  ;;  %s695_s15 = scalar_lea.hbm %s1318_s9, %s850_s17 }
  0x25   : > { %580 = vmatpush.msra.mxu2 %v571_v41  ;;  %631 = vmatpush.msra.mxu3 %v605_v60  ;;  %v599_v6 = vld [vmem:[%s422_s20] sm:$0xff]  ;;  %s698_s24 = sshll.u32 %s695_s15, 4  ;;  %s699_s24 = int_to_ptr.hbm [resolvable:$true] %s698_s24 }
  0x26   : > { %485 = vmatpush.msra.mxu0 %v470_v7  ;;  %v917_v12 = vld [vmem:[%s1317_s8] ss:$0 sm:$0xff]  ;;  %s948_s18 = sshra.s32 %s699_s24, 4  ;;  %s949_s18 = int_to_ptr.hbm [resolvable:$true] %s948_s18 }
  0x27   : > { %581 = vmatpush.msra.mxu2 %v570_v42  ;;  %632 = vmatpush.msra.mxu3 %v604_v4  ;;  %p955_p1 = scmp.lt.s32.totalorder %s949_s18, %s1318_s9 }
  0x28   : > { %486 = vmatpush.msra.mxu0 %v469_v8 }
  0x29   : > { %582 = vmatpush.msra.mxu2 %v569_v43  ;;  %633 = vmatpush.msra.mxu3 %v603_v5 }
  0x2a   : > { %487 = vmatpush.msra.mxu0 %v468_v9  ;;  %v600_v9 = vld [vmem:[%s422_s20 + $0x8] sm:$0xff]  ;;  %s950_s20 = scalar_lea.hbm %s949_s18, 16 }
  0x2b   : > { %583 = vmatpush.msra.mxu2 %v568_v44  ;;  %p951_p12 = scmp.ne.s32.totalorder %s949_s18, %s950_s20  ;;  %p956_p2 = scmp.lt.s32.totalorder %s954_s27, %s950_s20 }
  0x2c   : > { %488 = vmatpush.msra.mxu0 %v467_v10 }
  0x2d   : > { %584 = vmatpush.msra.mxu2 %v567_v46  ;;  %p952_p13 = pnand %p951_p12, %p1106_p4  ;;  %p957_p3 = por %p956_p2, %p955_p1 }
  0x2e   : > { %489 = vmatpush.msra.mxu0 %v466_v11 }
  0x2f   : > { %585 = vmatpush.msra.mxu2 %v566_v47  ;;  %p953_p0 = pneg %p952_p13 }
  0x30   : > { %490 = vmatpush.msra.mxu0 %v465_v13 }
  0x31   : > { %586 = vmatpush.msra.mxu2 %v565_v48  ;;  %p958_p5 = pnand %p957_p3, %p953_p0 }
  0x32   : > { %491 = vmatpush.msra.mxu0 %v464_v14 }
  0x33   : > { %587 = vmatpush.msra.mxu2 %v564_v49 }
  0x34   : > { %492 = vmatpush.msra.mxu0 %v463_v17 }
  0x35   : > { %588 = vmatpush.msra.mxu2 %v563_v53 }
  0x36   : > { %493 = vmatpush.msra.mxu0 %v462_v18 }
  0x37   : > { %494 = vmatmul.f32.vlgmr.msra.gmra.mxu0 %v460_v19  ;;  %589 = vmatpush.msra.mxu2 %v562_v54 }
  0x39   : > { %590 = vmatpush.msra.mxu2 %v561_v57 }
  0x3b   : > { %591 = vmatpush.msra.mxu2 %v560_v58 }
  0x3f   : > { %497 = vmatmul.f32.gmra.mxu0 %v461_v21 }
  0xb4   : > { %v495_v22 = vpop.f32.mrf.mxu0 }
  0xb5   : > { %v502_v23 = vsel %vm501_vm0, %v495_v22, -inf }
  0xb6   : > { %503 = vmax.xlane.f32.xlu0 %v502_v23 }
  0xbc   : > { %v498_v24 = vpop.f32.mrf.mxu0 }
  0xbd   : > { %v505_v25 = vsel %vm501_vm0, %v498_v24, -inf }
  0xbe   : > { %506 = vmax.xlane.f32.xlu0 %v505_v25 }
 0x129   : > { %v504_v26 = vpop.xlane.xlu0 %503 }
 0x12a   : > { %v508_v27 = vsub.f32 %v495_v22, %v504_v26 }
 0x12c   : > { %v510_v28 = vmul.f32 1.442695, %v508_v27 }
 0x12e   : > { %918 = vpow2.f32 %v510_v28 }
 0x131   : > { %v507_v29 = vpop.xlane.xlu0 %506 }
 0x132   : > { %v509_v30 = vsub.f32 %v498_v24, %v507_v29 }
 0x134   : > { %v919_v31 = vpop.eup %918  ;;  %v512_v32 = vmul.f32 1.442695, %v509_v30 }
 0x135   : > { %v514_v33 = vsel %vm501_vm0, %v919_v31, 0.0 }
 0x136   : > { %920 = vpow2.f32 %v512_v32  ;;  %515 = vadd.xlane.f32.xlu1 %v514_v33 }
 0x13c   : > { %v921_v34 = vpop.eup %920 }
 0x13d   : > { %v517_v35 = vsel %vm501_vm0, %v921_v34, 0.0 }
 0x13e   : > { %518 = vadd.xlane.f32.xlu1 %v517_v35 }
 0x1a9   : > { %v516_v45 = vpop.xlane.xlu1 %515 }
 0x1aa   : > { %922 = vrcp.f32 %v516_v45 }
 0x1b0   : > { %v923_v50 = vpop.eup %922 }
 0x1b1   : > { %v519_v51 = vpop.xlane.xlu1 %518  ;;  %v522_v52 = vmul.f32 %v923_v50, %v919_v31 }
 0x1b2   : > { %924 = vrcp.f32 %v519_v51 }
 0x1b3   : > { %836 = vmatmul.msk.f32.vlgmr.msra.gmra.mxu1 %vm501_vm0, %v522_v52 }
 0x1b8   : > { %v925_v55 = vpop.eup %924 }
 0x1b9   : > { %v523_v56 = vmul.f32 %v925_v55, %v921_v34 }
 0x1bb   : > { %837 = vmatmul.msk.f32.gmra.mxu1 %vm501_vm0, %v523_v56 }
 0x230   : > { %v552_v63 = vpop.f32.mrf.mxu1 }
 0x231   : > { %v558_v0 = vmul.f32 %v853_v62, %v552_v63 }
 0x233   : > { %592 = vmatmul.f32.vlgmr.msra.gmra.mxu2 %v558_v0 }
 0x238   : > { %v555_v2 = vpop.f32.mrf.mxu1 }
 0x239   : > { %v559_v3 = vmul.f32 %v854_v1, %v555_v2 }
 0x23b   : > { %595 = vmatmul.f32.gmra.mxu2 %v559_v3 }
 0x2b6   : > { %v593_v7 = vpop.f32.mrf.mxu2 }
 0x2b7   : > { %v601_v8 = vadd.f32 %v599_v6, %v593_v7 }
 0x2b9   : > { %838 = vmatmul.msk.f32.vlgmr.msra.gmra.mxu3 %vm611_vm2, %v601_v8 }
 0x2be   : > { %v596_v10 = vpop.f32.mrf.mxu2 }
 0x2bf   : > { %v602_v11 = vadd.f32 %v600_v9, %v596_v10 }
 0x2c1   : > { %839 = vmatmul.msk.f32.gmra.mxu3 %vm611_vm2, %v602_v11 }
 0x33c   : > { %v635_v13 = vpop.f32.mrf.mxu3 }
 0x33d   : > { %v636_v14 = vadd.f32 %v917_v12, %v635_v13 }
 0x33f   : > { %v840_v15 = vmul.f32 -1.442695, %v636_v14 }
 0x341   : > { %926 = vpow2.f32 %v840_v15 }
 0x344   : > { %v638_v16 = vpop.f32.mrf.mxu3 }
 0x345   : > { %v639_v17 = vadd.f32 %v917_v12, %v638_v16 }
 0x347   : > { %v927_v18 = vpop.eup %926  ;;  %v841_v19 = vmul.f32 -1.442695, %v639_v17 }
 0x348   : > { %v647_v20 = vadd.f32 1.0, %v927_v18 }
 0x349   : > { %928 = vpow2.f32 %v841_v19 }
 0x34a   : > { %930 = vrcp.f32 %v647_v20  ;;  %v660_v26 = vand.u32 2147483648, %v647_v20  ;;  %v658_v28 = vand.u32 2147483647, %v647_v20  ;;  %vm654_vm4 = vweird.f32 %v647_v20 }
 0x34c   : > { %v661_v31 = vor.u32 1.1754944e-38, %v660_v26  ;;  %vm659_vm6 = vcmp.eq.f32.partialorder %v658_v28, 8.507059e+37 }
 0x34f   : > { %v929_v21 = vpop.eup %928 }
 0x350   : > { %v931_v22 = vpop.eup %930  ;;  %v648_v23 = vadd.f32 1.0, %v929_v21 }
 0x351   : > { %v650_v24 = vmul.f32 %v931_v22, %v647_v20  ;;  %vm655_vm3 = vweird.f32 %v931_v22 }
 0x352   : > { %932 = vrcp.f32 %v648_v23  ;;  %vm656_vm5 = vmor %vm654_vm4, %vm655_vm3  ;;  %v675_v36 = vand.u32 2147483648, %v648_v23  ;;  %v673_v38 = vand.u32 2147483647, %v648_v23  ;;  %vm669_vm8 = vweird.f32 %v648_v23 }
 0x353   : > { %v651_v25 = vsub.f32 1.0, %v650_v24 }
 0x354   : > { %v676_v40 = vor.u32 1.1754944e-38, %v675_v36  ;;  %vm674_vm10 = vcmp.eq.f32.partialorder %v673_v38, 8.507059e+37 }
 0x355   : > { %v652_v27 = vmul.f32 %v931_v22, %v651_v25 }
 0x357   : > { %v653_v29 = vadd.f32 %v931_v22, %v652_v27 }
 0x358   : > { %v933_v30 = vpop.eup %932 }
 0x359   : > { %v665_v32 = vmul.f32 %v933_v30, %v648_v23  ;;  %v657_v33 = vsel %vm656_vm5, %v931_v22, %v653_v29  ;;  %vm670_vm7 = vweird.f32 %v933_v30 }
 0x35a   : > { %v662_v34 = vsel %vm659_vm6, %v661_v31, %v657_v33  ;;  %vm671_vm9 = vmor %vm669_vm8, %vm670_vm7 }
 0x35b   : > { %v666_v35 = vsub.f32 1.0, %v665_v32  ;;  %679 = vst.msk [vmem:[%s413_s23] sm:$0xff] %vm611_vm2, %v662_v34 }
 0x35d   : > { %v667_v37 = vmul.f32 %v933_v30, %v666_v35 }
 0x35f   : > { %v668_v39 = vadd.f32 %v933_v30, %v667_v37 }
 0x361   : > { %v672_v41 = vsel %vm671_vm9, %v933_v30, %v668_v39 }
 0x362   : > { %v677_v42 = vsel %vm674_vm10, %v676_v40, %v672_v41 }
 0x363   : > { %680 = vst.msk [vmem:[%s413_s23 + $0x8] sm:$0xff] %vm611_vm2, %v677_v42 }
 0x364   : > { %961 = shalt.err (!%p958_p5)
}
 0x365   : > { %s1014_s29 = smov 128   ;;  %s1015_s3 = smov 8  }
 0x366   : > { %859 = dma.vmem_to_hbm [thread:$0]  (%p1106_p4), %s697_s12, 256, %s699_s24, %s682_s16, %s1014_s29, %s1014_s29, %s1015_s3  }
 0x367 PF: > { %p865_p6 = scmp.ge.s32.totalorder %s1012_s14, 2  ;;  %s713_s15 = sand.u32 1, %s992_s30  }
 0x368   : > { %s714_s23 = scalar_lea.sflag [#allocation3], %s713_s15 }
 0x369   : > { %p862_p7 = pnand %p865_p6, %p1113_p8 }
 0x36b   : > { %p863_p9 = pneg %p862_p7 }
 0x36d   : > { %987 = dma.done.wait (%p863_p9), %s714_s23, 256  }
 0x36e   : > { %989 = vsyncadd (%p863_p9), %s714_s23, 4294967040  ;;  %s22_s14 = sadd.s32 1, %s1012_s14   ;;  %s1325_s19 = sld [smem:[#allocation5_spill]] }
 0x36f   : > { %p19_p10 = scmp.ge.s32.totalorder %s22_s14, 4   ;;  %s1326_s30 = smov %s996_s10 }
 0x370   : > { %s1327_s10 = smov %s1000_s11  ;;  %s1328_s11 = smov %s1119_s22 }
 0x371   : > { %s1329_s12 = smov %s1008_s13  ;;  %21 = sbr.rel (!%p19_p10) target bundleno = 6 (0x6), region = 100 }
 0x374   : > { %s1330_s13 = smov %s1325_s19 }
 0x376   :  { %720 = vsyncpa [#allocation3], 1 }
 0x377   :  { %722 = vsyncpa [#allocation3 + $0x1], 1 }

</bundles_post_ra>
